<compile_context>
chip_gen: v7x
topology: tpu7x:2x2x1
jax: 0.10.0
libtpu: 0.0.40
codegen_flags: <defaults>
</compile_context>

<pallas_src>
import jax
import jax.numpy as jnp
from jax.experimental import pallas as pl
from jax.experimental.pallas import tpu as pltpu


def _pick_query_tile(n: int) -> int:
    """Largest tile (<= 256, per v7x VMEM guidance) that divides N."""
    for t in (256, 128, 64, 32, 16, 8):
        if t <= n and n % t == 0:
            return t
    # TODO(synk): non-divisible N falls back to a full-extent query block;
    # switch to a ragged (pl.cdiv) grid if this ever exceeds VMEM.
    return n


def _vmem_limit_bytes(est_bytes: int) -> int:
    """Clamp the requested scoped-VMEM limit to a generation-aware ceiling."""
    cap = 96 * 1024 * 1024
    try:
        cap = min(cap, int(pltpu.get_tpu_info().vmem_capacity_bytes * 0.9))
    except Exception:
        pass
    return int(max(32 * 1024 * 1024, min(cap, est_bytes)))


def make_cross_attention_kernel(n_heads: int):
    def kernel(q_ref, kt_ref, v_ref, wo_ref, bo_ref, out_ref, attn_ref):
        # grid = (batch, q_tile, head); head MUST stay the innermost axis.
        h = pl.program_id(2)
        cdt = q_ref.dtype                     # MXU operand dtype (= input dtype)

        q = q_ref[0, 0]                       # [TQ, d_head]  (already * 1/sqrt(dh))
        kt = kt_ref[0, 0]                     # [d_head, M]
        v = v_ref[0, 0]                       # [M, d_head]

        # Scores in f32 (plain matmul, K pre-transposed in the wrapper).
        s = jnp.dot(q, kt, preferred_element_type=jnp.float32)        # [TQ, M]

        # Numerically-stable softmax; normalize AFTER the PV matmul so the
        # reciprocal multiply touches [TQ, d_head] instead of [TQ, M] and can
        # be exact for free.
        s = s - jnp.max(s, axis=-1, keepdims=True)
        p = jnp.exp(s)
        denom = jnp.sum(p, axis=-1, keepdims=True)                     # [TQ, 1]
        attn = jnp.dot(p.astype(cdt), v,
                       preferred_element_type=jnp.float32)             # [TQ, dh]
        attn = attn * pl.reciprocal(denom, approx=False)

        # Stash this head's output in the persistent slab (dynamic index on
        # the leading, untiled axis only).
        attn_ref[h] = attn.astype(attn_ref.dtype)

        @pl.when(h == pl.num_programs(2) - 1)
        def _():
            # Fused output projection: one deep-K (d_attn) GEMM against the
            # resident full Wo, single lane-dense store of the output tile.
            slab = jnp.concatenate(
                [attn_ref[i] for i in range(n_heads)], axis=-1)        # [TQ, d_attn]
            out = jnp.dot(slab, wo_ref[...],
                          preferred_element_type=jnp.float32)          # [TQ, d_model]
            out_ref[0] = (out + bo_ref[...].astype(jnp.float32)).astype(out_ref.dtype)

    return kernel


def cross_attention(x, cond_emb, params, n_heads, d_head):
    """x: [B, N, d_model], cond_emb: [B, M, d_cond] or None (self-attention)."""
    if cond_emb is None:
        cond_emb = x
    B, N, d_model = x.shape
    _, M, d_cond = cond_emb.shape

    wq, wk, wv, wo, bo = params
    d_attn = n_heads * d_head
    scale = d_head ** (-0.5)

    # Full-width projection GEMMs in the wrapper (lane-dense, done once; the
    # kernel grid would otherwise recompute K/V per query tile and run
    # d_head-narrow matmuls).  Scale is folded into Wq.
    q = (x @ (wq * scale)).reshape(B, N, n_heads, d_head)
    q = q.transpose(0, 2, 1, 3)                          # [B, H, N, d_head]
    k = (cond_emb @ wk).reshape(B, M, n_heads, d_head)
    kt = k.transpose(0, 2, 3, 1)                         # [B, H, d_head, M]
    v = (cond_emb @ wv).reshape(B, M, n_heads, d_head)
    v = v.transpose(0, 2, 1, 3)                          # [B, H, M, d_head]
    bo2d = bo.reshape(1, d_model)

    tq = _pick_query_tile(N)
    grid = (B, N // tq, n_heads)

    # VMEM budget: double-buffered pipeline blocks + persistent scratch +
    # in-kernel f32 score/prob temporaries, with headroom.
    bpe = jnp.dtype(x.dtype).itemsize
    block_bytes = (tq * d_head + d_head * M + M * d_head
                   + d_attn * d_model + d_model + tq * d_model) * bpe
    est = int(1.25 * (2 * block_bytes
                      + n_heads * tq * d_head * bpe
                      + 2 * tq * M * 4
                      + tq * d_attn * bpe))
    vmem_limit = _vmem_limit_bytes(est)

    kernel = make_cross_attention_kernel(n_heads)

    return pl.pallas_call(
        kernel,
        out_shape=jax.ShapeDtypeStruct((B, N, d_model), x.dtype),
        grid=grid,
        in_specs=[
            pl.BlockSpec((1, 1, tq, d_head), lambda b, qi, h: (b, h, qi, 0)),   # Q[b,h]
            pl.BlockSpec((1, 1, d_head, M), lambda b, qi, h: (b, h, 0, 0)),     # K^T[b,h]
            pl.BlockSpec((1, 1, M, d_head), lambda b, qi, h: (b, h, 0, 0)),     # V[b,h]
            pl.BlockSpec((d_attn, d_model), lambda b, qi, h: (0, 0)),           # Wo (resident)
            pl.BlockSpec((1, d_model), lambda b, qi, h: (0, 0)),                # bias_o
        ],
        out_specs=pl.BlockSpec((1, tq, d_model), lambda b, qi, h: (b, qi, 0)),
        scratch_shapes=[pltpu.VMEM((n_heads, tq, d_head), x.dtype)],
        compiler_params=pltpu.CompilerParams(
            dimension_semantics=("parallel", "parallel", "arbitrary"),
            vmem_limit_bytes=vmem_limit),
    )(q, kt, v, wo, bo2d)


def reference_cross_attention(x, cond_emb, params, n_heads, d_head):
    """Pure-JAX reference matching the PyTorch forward semantics."""
    if cond_emb is None:
        cond_emb = x
    wq, wk, wv, wo, bo = params
    scale = d_head ** (-0.5)
    q = x @ wq
    k = cond_emb @ wk
    v = cond_emb @ wv
    B, N, _ = q.shape
    M = k.shape[1]
    q = q.reshape(B, N, n_heads, d_head)
    k = k.reshape(B, M, n_heads, d_head)
    v = v.reshape(B, M, n_heads, d_head)
    attn = jnp.einsum('bihd,bjhd->bhij', q, k) * scale
    attn = jax.nn.softmax(attn, axis=-1)
    out = jnp.einsum('bhij,bjhd->bihd', attn, v).reshape(B, N, n_heads * d_head)
    return out @ wo + bo


if __name__ == "__main__":
    # Small shapes consistent with the module's forward signature.
    B = 2            # batch_size
    N = 16           # n_channels (query tokens)
    M = 8            # n_cond_emb (key/value tokens)
    d_model = 32
    d_cond = 16
    n_heads = 4
    d_head = 8
    d_attn = n_heads * d_head

    key = jax.random.PRNGKey(0)
    kx, kc, k1, k2, k3, k4, k5 = jax.random.split(key, 7)

    x = jax.random.normal(kx, (B, N, d_model), dtype=jnp.float32)
    cond = jax.random.normal(kc, (B, M, d_cond), dtype=jnp.float32)

    # Deterministic parameter init (Linear weights stored as [in, out]).
    wq = jax.random.normal(k1, (d_model, d_attn), dtype=jnp.float32) * 0.05
    wk = jax.random.normal(k2, (d_cond, d_attn), dtype=jnp.float32) * 0.05
    wv = jax.random.normal(k3, (d_cond, d_attn), dtype=jnp.float32) * 0.05
    wo = jax.random.normal(k4, (d_attn, d_model), dtype=jnp.float32) * 0.05
    bo = jax.random.normal(k5, (d_model,), dtype=jnp.float32) * 0.01
    params = (wq, wk, wv, wo, bo)

    out = cross_attention(x, cond, params, n_heads, d_head)
    out = jax.block_until_ready(out)

    ref = reference_cross_attention(x, cond, params, n_heads, d_head)
    assert out.shape == (B, N, d_model)
    assert jnp.allclose(out, ref, atol=1e-3, rtol=1e-3), "mismatch vs reference"

    # Also exercise the self-attention path (cond_emb=None -> cond_emb=x).
    wk_s = jax.random.normal(k2, (d_model, d_attn), dtype=jnp.float32) * 0.05
    wv_s = jax.random.normal(k3, (d_model, d_attn), dtype=jnp.float32) * 0.05
    params_self = (wq, wk_s, wv_s, wo, bo)
    out_self = jax.block_until_ready(
        cross_attention(x, None, params_self, n_heads, d_head))
    ref_self = reference_cross_attention(x, None, params_self, n_heads, d_head)
    assert out_self.shape == (B, N, d_model)
    assert jnp.allclose(out_self, ref_self, atol=1e-3, rtol=1e-3), \
        "self-attention mismatch vs reference"

    print("KERNEL_OK")
</pallas_src>

<mosaic_0001>
module attributes {stable_mosaic.version = 11 : i64} {
  func.func @kernel(%arg0: i32, %arg1: i32, %arg2: i32, %arg3: memref<1x1x16x8xf32, #tpu.memory_space<vmem>>, %arg4: memref<1x1x8x8xf32, #tpu.memory_space<vmem>>, %arg5: memref<1x1x8x8xf32, #tpu.memory_space<vmem>>, %arg6: memref<32x32xf32, #tpu.memory_space<vmem>>, %arg7: memref<1x32xf32, #tpu.memory_space<vmem>>, %arg8: memref<1x16x32xf32, #tpu.memory_space<vmem>>, %arg9: memref<4x16x8xf32, #tpu.memory_space<vmem>>) attributes {dimension_semantics = [#tpu.dimension_semantics<parallel>, #tpu.dimension_semantics<parallel>, #tpu.dimension_semantics<arbitrary>], iteration_bounds = array<i64: 2, 1, 4>, scalar_prefetch = 0 : i64, scratch_operands = 1 : i64, tpu.core_type = #tpu.core_type<tc>, window_params = [{transform_indices = @transform_0, window_bounds = array<i64: 1, 1, 16, 8>}, {transform_indices = @transform_1, window_bounds = array<i64: 1, 1, 8, 8>}, {transform_indices = @transform_2, window_bounds = array<i64: 1, 1, 8, 8>}, {pipeline_mode = #tpu.pipeline_mode<synchronous>, transform_indices = @transform_3, window_bounds = array<i64: 32, 32>}, {pipeline_mode = #tpu.pipeline_mode<synchronous>, transform_indices = @transform_4, window_bounds = array<i64: 1, 32>}, {transform_indices = @transform_5, window_bounds = array<i64: 1, 16, 32>}]} {
    %c0 = arith.constant 0 : index
    %c0_0 = arith.constant 0 : index
    %c0_1 = arith.constant 0 : index
    %c0_2 = arith.constant 0 : index
    %0 = vector.load %arg3[%c0, %c0_0, %c0_1, %c0_2] : memref<1x1x16x8xf32, #tpu.memory_space<vmem>>, vector<1x1x16x8xf32>
    %1 = vector.shape_cast %0 : vector<1x1x16x8xf32> to vector<16x8xf32>
    %c0_3 = arith.constant 0 : index
    %c0_4 = arith.constant 0 : index
    %c0_5 = arith.constant 0 : index
    %c0_6 = arith.constant 0 : index
    %2 = vector.load %arg4[%c0_3, %c0_4, %c0_5, %c0_6] : memref<1x1x8x8xf32, #tpu.memory_space<vmem>>, vector<1x1x8x8xf32>
    %3 = vector.shape_cast %2 : vector<1x1x8x8xf32> to vector<8x8xf32>
    %c0_7 = arith.constant 0 : index
    %c0_8 = arith.constant 0 : index
    %c0_9 = arith.constant 0 : index
    %c0_10 = arith.constant 0 : index
    %4 = vector.load %arg5[%c0_7, %c0_8, %c0_9, %c0_10] : memref<1x1x8x8xf32, #tpu.memory_space<vmem>>, vector<1x1x8x8xf32>
    %5 = vector.shape_cast %4 : vector<1x1x8x8xf32> to vector<8x8xf32>
    %cst = arith.constant dense<0.000000e+00> : vector<16x8xf32>
    %6 = tpu.matmul %1, %3, %cst {dimension_numbers = #tpu.dot_dimension_numbers<[1], [0], [0], [1], [0, 0, 1, 1], [], []>} : vector<16x8xf32>, vector<8x8xf32>, vector<16x8xf32> -> vector<16x8xf32>
    %cst_11 = arith.constant dense<0xFF800000> : vector<16xf32>
    %7 = vector.multi_reduction <maximumf>, %6, %cst_11 [1] : vector<16x8xf32> to vector<16xf32>
    %8 = vector.shape_cast %7 : vector<16xf32> to vector<16x1xf32>
    %9 = vector.broadcast %8 : vector<16x1xf32> to vector<16x8xf32>
    %10 = arith.subf %6, %9 : vector<16x8xf32>
    %11 = math.exp %10 : vector<16x8xf32>
    %cst_12 = arith.constant dense<0.000000e+00> : vector<16xf32>
    %12 = vector.multi_reduction <add>, %11, %cst_12 [1] : vector<16x8xf32> to vector<16xf32>
    %13 = vector.shape_cast %12 : vector<16xf32> to vector<16x1xf32>
    %cst_13 = arith.constant dense<0.000000e+00> : vector<16x8xf32>
    %14 = tpu.matmul %11, %5, %cst_13 {dimension_numbers = #tpu.dot_dimension_numbers<[1], [0], [0], [1], [0, 0, 1, 1], [], []>} : vector<16x8xf32>, vector<8x8xf32>, vector<16x8xf32> -> vector<16x8xf32>
    %15 = tpu.reciprocal %13 : vector<16x1xf32> -> vector<16x1xf32>
    %16 = vector.broadcast %15 : vector<16x1xf32> to vector<16x8xf32>
    %17 = arith.mulf %14, %16 : vector<16x8xf32>
    %18 = arith.index_cast %arg2 : i32 to index
    %c0_14 = arith.constant 0 : index
    %c0_15 = arith.constant 0 : index
    %19 = vector.load %arg9[%18, %c0_14, %c0_15] : memref<4x16x8xf32, #tpu.memory_space<vmem>>, vector<1x16x8xf32>
    %20 = vector.shape_cast %19 : vector<1x16x8xf32> to vector<16x8xf32>
    %21 = vector.shape_cast %17 : vector<16x8xf32> to vector<1x16x8xf32>
    tpu.vector_store %arg9[%18, %c0_14, %c0_15], %21 {strides = array<i32>} : memref<4x16x8xf32, #tpu.memory_space<vmem>>, vector<1x16x8xf32>,
    %c3_i32 = arith.constant 3 : i32
    %22 = arith.cmpi eq, %arg2, %c3_i32 : i32
    %23 = arith.extui %22 : i1 to i32
    %c0_i32 = arith.constant 0 : i32
    %24 = arith.cmpi ne, %23, %c0_i32 : i32
    scf.if %24 {
      %c0_16 = arith.constant 0 : index
      %c0_17 = arith.constant 0 : index
      %c0_18 = arith.constant 0 : index
      %25 = vector.load %arg9[%c0_16, %c0_17, %c0_18] : memref<4x16x8xf32, #tpu.memory_space<vmem>>, vector<1x16x8xf32>
      %26 = vector.shape_cast %25 : vector<1x16x8xf32> to vector<16x8xf32>
      %c1 = arith.constant 1 : index
      %c0_19 = arith.constant 0 : index
      %c0_20 = arith.constant 0 : index
      %27 = vector.load %arg9[%c1, %c0_19, %c0_20] : memref<4x16x8xf32, #tpu.memory_space<vmem>>, vector<1x16x8xf32>
      %28 = vector.shape_cast %27 : vector<1x16x8xf32> to vector<16x8xf32>
      %c2 = arith.constant 2 : index
      %c0_21 = arith.constant 0 : index
      %c0_22 = arith.constant 0 : index
      %29 = vector.load %arg9[%c2, %c0_21, %c0_22] : memref<4x16x8xf32, #tpu.memory_space<vmem>>, vector<1x16x8xf32>
      %30 = vector.shape_cast %29 : vector<1x16x8xf32> to vector<16x8xf32>
      %c3 = arith.constant 3 : index
      %c0_23 = arith.constant 0 : index
      %c0_24 = arith.constant 0 : index
      %31 = vector.load %arg9[%c3, %c0_23, %c0_24] : memref<4x16x8xf32, #tpu.memory_space<vmem>>, vector<1x16x8xf32>
      %32 = vector.shape_cast %31 : vector<1x16x8xf32> to vector<16x8xf32>
      %33 = tpu.concatenate %26, %28, %30, %32 in 1 : vector<16x8xf32>, vector<16x8xf32>, vector<16x8xf32>, vector<16x8xf32> -> vector<16x32xf32>
      %c0_25 = arith.constant 0 : index
      %c0_26 = arith.constant 0 : index
      %34 = vector.load %arg6[%c0_25, %c0_26] : memref<32x32xf32, #tpu.memory_space<vmem>>, vector<32x32xf32>
      %cst_27 = arith.constant dense<0.000000e+00> : vector<16x32xf32>
      %35 = tpu.matmul %33, %34, %cst_27 {dimension_numbers = #tpu.dot_dimension_numbers<[1], [0], [0], [1], [0, 0, 1, 1], [], []>} : vector<16x32xf32>, vector<32x32xf32>, vector<16x32xf32> -> vector<16x32xf32>
      %c0_28 = arith.constant 0 : index
      %c0_29 = arith.constant 0 : index
      %36 = vector.load %arg7[%c0_28, %c0_29] : memref<1x32xf32, #tpu.memory_space<vmem>>, vector<1x32xf32>
      %37 = vector.broadcast %36 : vector<1x32xf32> to vector<16x32xf32>
      %38 = arith.addf %35, %37 : vector<16x32xf32>
      %c0_30 = arith.constant 0 : index
      %c0_31 = arith.constant 0 : index
      %c0_32 = arith.constant 0 : index
      %39 = vector.load %arg8[%c0_30, %c0_31, %c0_32] : memref<1x16x32xf32, #tpu.memory_space<vmem>>, vector<1x16x32xf32>
      %40 = vector.shape_cast %39 : vector<1x16x32xf32> to vector<16x32xf32>
      %41 = vector.shape_cast %38 : vector<16x32xf32> to vector<1x16x32xf32>
      tpu.vector_store %arg8[%c0_30, %c0_31, %c0_32], %41 {strides = array<i32>} : memref<1x16x32xf32, #tpu.memory_space<vmem>>, vector<1x16x32xf32>,
    } else {
    }
    return
  }
  func.func @transform_0(%arg0: i32, %arg1: i32, %arg2: i32) -> (i32, i32, i32, i32) {
    %c0_i32 = arith.constant 0 : i32
    %c0_i32_0 = arith.constant 0 : i32
    return %arg0, %arg2, %arg1, %c0_i32 : i32, i32, i32, i32
  }
  func.func @transform_1(%arg0: i32, %arg1: i32, %arg2: i32) -> (i32, i32, i32, i32) {
    %c0_i32 = arith.constant 0 : i32
    %c0_i32_0 = arith.constant 0 : i32
    %c0_i32_1 = arith.constant 0 : i32
    return %arg0, %arg2, %c0_i32, %c0_i32_0 : i32, i32, i32, i32
  }
  func.func @transform_2(%arg0: i32, %arg1: i32, %arg2: i32) -> (i32, i32, i32, i32) {
    %c0_i32 = arith.constant 0 : i32
    %c0_i32_0 = arith.constant 0 : i32
    %c0_i32_1 = arith.constant 0 : i32
    return %arg0, %arg2, %c0_i32, %c0_i32_0 : i32, i32, i32, i32
  }
  func.func @transform_3(%arg0: i32, %arg1: i32, %arg2: i32) -> (i32, i32) {
    %c0_i32 = arith.constant 0 : i32
    %c0_i32_0 = arith.constant 0 : i32
    %c0_i32_1 = arith.constant 0 : i32
    return %c0_i32, %c0_i32_0 : i32, i32
  }
  func.func @transform_4(%arg0: i32, %arg1: i32, %arg2: i32) -> (i32, i32) {
    %c0_i32 = arith.constant 0 : i32
    %c0_i32_0 = arith.constant 0 : i32
    %c0_i32_1 = arith.constant 0 : i32
    return %c0_i32, %c0_i32_0 : i32, i32
  }
  func.func @transform_5(%arg0: i32, %arg1: i32, %arg2: i32) -> (i32, i32, i32) {
    %c0_i32 = arith.constant 0 : i32
    %c0_i32_0 = arith.constant 0 : i32
    return %arg0, %arg1, %c0_i32 : i32, i32, i32
  }
}

</mosaic_0001>

<bundles_post_ra>
// kernel: tpu_custom_call.1
= control target key start
LH: loop header
LB: loop body
LE: loop exit
PB: predicated region body
PF: predicated region fallthrough
CT: control target
= control target key end

     0   :  { %10 = vsyncpa [#allocation4], 0  ;;  %s1286_s0 = inlined_call_operand.vmem [shape: f32[2,4,16,8], index: 0, kind: input, shape index: {}]   ;;  %s1287_s1 = inlined_call_operand.vmem [shape: f32[2,4,8,8], index: 1, kind: input, shape index: {}]   ;;  %s1288_s2 = inlined_call_operand.vmem [shape: f32[2,4,8,8], index: 2, kind: input, shape index: {}]   ;;  %s1289_s3 = inlined_call_operand.vmem [shape: f32[32,32], index: 3, kind: input, shape index: {}]   ;;  %s1290_s4 = inlined_call_operand.vmem [shape: f32[1,32], index: 4, kind: input, shape index: {}]   ;;  %s1291_s5 = inlined_call_operand.hbm [shape: f32[2,16,32], index: 5, kind: output, shape index: {}]  }
   0x1   :  { %12 = vsyncpa [#allocation4 + $0x1], 0  ;;  %s1102_s18 = smov 0   ;;  %s1104_s19 = smov 0  }
   0x2   :  { %s1106_s20 = smov 0   ;;  %s1108_s21 = smov 0  }
   0x3   :  { %s1110_s22 = smov 0   ;;  %s1112_s23 = smov 0  }
   0x4   :  { %s1114_s24 = smov 0   ;;  %s1116_s25 = smov 0  }
   0x5 LB: > { %1296 = sst [smem:[#allocation6_spill]] %s1056_s23  ;;  %s817_s26 = sadd.s32 4294967295, %s1064_s25   ;;  %s1064_s25 = sphi %s1116_s25, %s18_s25   ;;  %s1060_s24 = sphi %s1114_s24, %s1306_s24   ;;  %s1056_s23 = sphi %s1112_s23, %s1305_s23   ;;  %s1052_s22 = sphi %s1110_s22, %s1304_s22   ;;  %s1048_s21 = sphi %s1108_s21, %s1303_s21   ;;  %s1044_s20 = sphi %s1106_s20, %s1309_s20   ;;  %s1040_s19 = sphi %s1104_s19, %s1308_s19   ;;  %s1036_s18 = sphi %s1102_s18, %s1307_s18  }
   0x6   : > { %1297 = sst [smem:[#allocation7_spill]] %s1060_s24  ;;  %s818_s27 = sadd.s32 4294967294, %s1064_s25  }
   0x7   : > { %s30_s28 = sadd.s32 1, %s1056_s23  ;;  %s37_s29 = sadd.s32 1, %s1060_s24 }
   0x8   : > { %p31_p0 = scmp.ge.s32.totalorder %s30_s28, 4  ;;  %p184_p1 = scmp.ne.s32.totalorder %s1044_s20, %s1040_s19 }
   0x9   : > { %p185_p2 = scmp.eq.s32.totalorder %s817_s26, 7  ;;  %p190_p4 = scmp.ne.s32.totalorder %s1040_s19, %s1036_s18 }
   0xa   : > { %s1311_s28 = smov (%p31_p0, %s30_s28), 0  ;;  %s1313_s29 = smov (!%p31_p0, %s37_s29), %s1060_s24 }
   0xb   : > { %1298 = sst [smem:[#allocation8_spill]] %s1311_s28  ;;  %p1151_p3 = por %p185_p2, %p184_p1 }
   0xc   : > { %p39_p5 = scmp.ge.s32.totalorder %s1313_s29, 2  ;;  %p191_p6 = scmp.eq.s32.totalorder %s818_s27, 7 }
   0xd   : > { %p821_p7 = scmp.ge.s32.totalorder %s1064_s25, 1  ;;  %p254_p8 = scmp.lt.s32.totalorder %s1064_s25, 9 }
   0xe   : > { %s1315_s29 = smov (%p39_p5, %s1313_s29), 0  ;;  %p1161_p9 = por %p191_p6, %p190_p4 }
   0xf   : > { %1300 = sst [smem:[#allocation9_spill]] %s1315_s29  ;;  %p255_p10 = pnand %p821_p7, %p254_p8 }
  0x10   : > { %s169_s7 = ssub.s32 %s1060_s24, %s1315_s29  ;;  %s174_s8 = sadd.s32 1, %s1044_s20  ;;  %vm341_vm0 = vcmask (!%p255_p10), 64512  }
  0x11   : > { %p172_p11 = scmp.eq.s32.totalorder %s169_s7, 0  ;;  %258 = sbr.rel (%p255_p10) target bundleno = 998 (0x3e6), region = 40 }
  0x12   : > { %s1295_s10 = sand.u32 (!%p255_p10), 1, %s1040_s19   ;;  %p307_p12 = scmp.lt.s32.totalorder (!%p255_p10), %s1052_s22, 1 }
  0x13   : > { %s1169_s9 = scalar_select %p172_p11, %s1044_s20, %s174_s8  }
  0x14   : > { %s1175_s11 = sshll.u32 (!%p255_p10), %s1295_s10, 4  ;;  %p309_p13 = scmp.lt.s32.totalorder (!%p255_p10), %s1048_s21, 3 }
  0x15   : > { %s834_s24 = sshll.u32 (!%p255_p10), %s1048_s21, 4  ;;  %p835_p0 = scmp.ne.s32.totalorder (!%p255_p10), %s1048_s21, 3 }
  0x18   : > { %s308_s12 = scalar_select %p307_p12, %s1052_s22, 1 }
  0x19   : > { %s310_s13 = scalar_select %p309_p13, %s1048_s21, 3 }
  0x1a   : > { %s826_s14 = sshll.u32 %s308_s12, 2  ;;  %s824_s15 = sshll.u32 %s308_s12, 3  ;;  %v577_v30 = vld [vmem:[%s1289_s3] sm:$0xff] (!%p835_p0)  ;;  %v578_v31 = vld [vmem:[%s1289_s3 + $0x8] sm:$0xff] (!%p835_p0)  ;;  %v579_v33 = vld [vmem:[%s1289_s3 + $0x10] sm:$0xff] (!%p835_p0)  ;;  %vm571_vm1 = vcmask (!%p835_p0), 130048  }
  0x1b   : > { %s325_s16 = sadd.s32 %s826_s14, %s310_s13  ;;  %s823_s17 = sshll.u32 %s310_s13, 1  ;;  %v878_v32 = vpack.c.bf16 (!%p835_p0), %v578_v31, %v577_v30  ;;  %v580_v34 = vld [vmem:[%s1289_s3 + $0x18] sm:$0xff] (!%p835_p0)  ;;  %vm574_vm2 = vcmask (!%p835_p0), 195584   ;;  %vm588_vm3 = vcmask (!%p835_p0), 261120   ;;  %v836_v52 = vld [vmem:[%s1290_s4] ss:$0 sm:$0xff] (!%p835_p0) }
  0x1c   : > { %s827_s26 = sshll.u32 %s325_s16, 3  ;;  %s316_s27 = sadd.s32 %s824_s15, %s823_s17  ;;  %v882_v35 = vpack.c.bf16 (!%p835_p0), %v580_v34, %v579_v33 }
  0x1d   : > { %s327_s29 = scalar_lea.vmem %s1287_s1, %s827_s26  ;;  %s825_s28 = sshll.u32 %s316_s27, 3 }
  0x1e   : > { %v339_v0 = vld [vmem:[%s327_s29] sm:$0xff]  ;;  %s318_s10 = scalar_lea.vmem %s1286_s0, %s825_s28  ;;  %s335_s23 = scalar_lea.vmem %s1288_s2, %s827_s26 }
  0x1f   : > { %857 = vmatprep.subr.mxu0 %v339_v0  ;;  %v337_v1 = vld [vmem:[%s318_s10] sm:$0xff]  ;;  %v338_v2 = vld [vmem:[%s318_s10 + $0x8] sm:$0xff]  ;;  %s527_s28 = scalar_lea.vmem [#allocation2], %s834_s24  ;;  %s1201_s10 = scalar_lea.vmem [#allocation3], %s1175_s11 }
  0x20   : > { %858 = vmatpush3.msra.mxu0 %v339_v0  ;;  %859 = vmatprep.mubr.msk.f32.mxu0 %vm341_vm0, %v337_v1  ;;  %v340_v7 = vld [vmem:[%s335_s23] sm:$0xff]  ;;  %s1066_s13 = smov (!%p835_p0), 16   ;;  %s1067_s14 = smov (!%p835_p0), 8  }
  0x21   : > { %860 = vmatmul.mubr.msk.f32.vlgmr.msra.gmra.mrb[0].mxu0 %vm341_vm0, %v338_v2  ;;  %862 = vmatprep.subr.mxu1 %v340_v7  ;;  %s1068_s8 = smov (!%p835_p0), 24  }
  0x22   : > { %863 = vmatpush3.msra.mxu1 %v340_v7  ;;  %879 = vmatprep.subr.bf16.mxu0 (!%p835_p0), %v878_v32 }
  0x23   : > { %881 = vmatpush3.bf16.msra.mxu0 (!%p835_p0), %v878_v32 }
  0x24   : > { %883 = vmatprep.subr.bf16.mxu0 (!%p835_p0), %v882_v35 }
  0x27   : > { %885 = vmatpush3.bf16.msra.mxu0 (!%p835_p0), %v882_v35 }
  0xf4   : > { %v861_v3 = vpop.f32.mrb[0].mxu0 }
  0xf5   : > { %v414_v4 = vpop.f32.mrb[1].mxu0  ;;  %v426_v6 = vsel %vm341_vm0, %v861_v3, -inf }
  0xf6   : > { %v423_v5 = vsel %vm341_vm0, %v414_v4, -inf }
  0xf7   : > { %424 = vmax.xlane.f32.xlu0 %v423_v5 }
  0xfb   : > { %427 = vmax.xlane.f32.xlu0 %v426_v6 }
 0x184   : > { %v425_v8 = vpop.xlane.xlu0 %424 }
 0x185   : > { %v429_v9 = vsub.f32 %v414_v4, %v425_v8 }
 0x187   : > { %v431_v10 = vmul.f32 1.442695, %v429_v9 }
 0x188   : > { %v428_v11 = vpop.xlane.xlu0 %427 }
 0x189   : > { %962 = vpow2.f32 %v431_v10  ;;  %v430_v12 = vsub.f32 %v861_v3, %v428_v11 }
 0x18b   : > { %v433_v13 = vmul.f32 1.442695, %v430_v12 }
 0x18d   : > { %964 = vpow2.f32 %v433_v13 }
 0x193   : > { %v963_v14 = vpop.eup %962 }
 0x194   : > { %864 = vmatprep.mubr.msk.f32.mxu1 %vm341_vm0, %v963_v14  ;;  %v435_v15 = vsel %vm341_vm0, %v963_v14, 0.0 }
 0x195   : > { %436 = vadd.xlane.f32.xlu1 %v435_v15 }
 0x197   : > { %v965_v16 = vpop.eup %964 }
 0x198   : > { %865 = vmatmul.mubr.msk.f32.vlgmr.msra.gmra.mrb[0].mxu1 %vm341_vm0, %v965_v16  ;;  %v438_v17 = vsel %vm341_vm0, %v965_v16, 0.0 }
 0x199   : > { %439 = vadd.xlane.f32.xlu1 %v438_v17 }
 0x222   : > { %v437_v18 = vpop.xlane.xlu1 %436 }
 0x226   : > { %v440_v19 = vpop.xlane.xlu1 %439 }
 0x227   : > { %966 = vrcp.f32 %v440_v19 }
 0x228   : > { %968 = vrcp.f32 %v437_v18 }
 0x231   : > { %v967_v20 = vpop.eup %966 }
 0x232   : > { %v969_v22 = vpop.eup %968 }
 0x269   : > { %533 = sbr.rel (%p835_p0) target bundleno = 972 (0x3cc), region = 44 }
 0x26b   : > { %v866_v21 = vpop.f32.mrb[0].mxu1 }
 0x26c   : > { %v525_v23 = vmul.f32 %v967_v20, %v866_v21  ;;  %v513_v24 = vpop.f32.mrb[1].mxu1 }
 0x26d   : > { %v524_v25 = vmul.f32 %v969_v22, %v513_v24 }
 0x26e   : > { %529 = vst.msk [vmem:[%s527_s28 + $0x8] sm:$0xff] %vm341_vm0, %v525_v23 }
 0x26f   : > { %528 = vst.msk [vmem:[%s527_s28] sm:$0xff] %vm341_vm0, %v524_v25 }
 0x276   : > { %v540_v26 = vld [vmem:[#allocation2 + $0x20] sm:$0xff]  ;;  %v537_v27 = vld [vmem:[#allocation2 + $0x10] sm:$0xff]  ;;  %v541_v28 = vld [vmem:[#allocation2 + $0x28] sm:$0xff] }
 0x277   : > { %555 = vrot.lane.b32.xlu1 %v540_v26, %s1066_s13  ;;  %547 = vrot.lane.b32.xlu0 %v537_v27, %s1067_s14  ;;  %v538_v29 = vld [vmem:[#allocation2 + $0x18] sm:$0xff]  ;;  %v543_v37 = vld [vmem:[#allocation2 + $0x30] sm:$0xff]  ;;  %v534_v40 = vld [vmem:[#allocation2] sm:$0xff] }
 0x278   : > { %v544_v36 = vld [vmem:[#allocation2 + $0x38] sm:$0xff]  ;;  %v535_v41 = vld [vmem:[#allocation2 + $0x8] sm:$0xff] }
 0x27b   : > { %557 = vrot.lane.b32.xlu1 %v541_v28, %s1066_s13  ;;  %549 = vrot.lane.b32.xlu0 %v538_v29, %s1067_s14 }
 0x27f   : > { %565 = vrot.lane.b32.xlu1 %v544_v36, %s1068_s8  ;;  %563 = vrot.lane.b32.xlu0 %v543_v37, %s1068_s8 }
 0x2e9   : > { %v556_v38 = vpop.permute.xlu1 %555  ;;  %v548_v39 = vpop.permute.xlu0 %547 }
 0x2ea   : > { %v569_v44 = vsel %vm341_vm0, %v534_v40, %v548_v39 }
 0x2eb   : > { %v572_v49 = vsel %vm571_vm1, %v569_v44, %v556_v38 }
 0x2ed   : > { %v558_v42 = vpop.permute.xlu1 %557  ;;  %v550_v43 = vpop.permute.xlu0 %549 }
 0x2ee   : > { %v570_v45 = vsel %vm341_vm0, %v535_v41, %v550_v43 }
 0x2ef   : > { %v573_v46 = vsel %vm571_vm1, %v570_v45, %v558_v42 }
 0x2f1   : > { %v566_v47 = vpop.permute.xlu1 %565  ;;  %v564_v48 = vpop.permute.xlu0 %563 }
 0x2f2   : > { %v576_v50 = vsel %vm574_vm2, %v573_v46, %v566_v47  ;;  %v575_v51 = vsel %vm574_vm2, %v572_v49, %v564_v48 }
 0x2f3   : > { %875 = vmatprep.mubr.msk.f32.mxu0 %vm588_vm3, %v575_v51 }
 0x2f4   : > { %876 = vmatmul.mubr.msk.f32.vlgmr.msra.gmra.mrb[0].mxu0 %vm588_vm3, %v576_v50 }
 0x3c7   : > { %v877_v53 = vpop.f32.mrb[0].mxu0 }
 0x3c8   : > { %v667_v54 = vadd.f32 %v877_v53, %v836_v52  ;;  %v661_v55 = vpop.f32.mrb[1].mxu0 }
 0x3c9   : > { %v662_v56 = vadd.f32 %v836_v52, %v661_v55 }
 0x3ca   : > { %671 = vst.msk [vmem:[%s1201_s10 + $0x8] sm:$0xff] %vm588_vm3, %v667_v54 }
 0x3cb   : > { %670 = vst.msk [vmem:[%s1201_s10] sm:$0xff] %vm588_vm3, %v662_v56 }
 0x3cc PF: > { %s844_s23 = sshll.u32 %s1052_s22, 8  ;;  %s688_s14 = sshll.u32 %s1201_s10, 4  ;;  %s1230_s14 = int_to_ptr.vmem [resolvable:$true] %s688_s14 }
 0x3cd   : > { %s1227_s13 = scalar_lea.hbm %s1291_s5, %s844_s23  ;;  %s1302_s15 = sand.u32 1, %s1040_s19  }
 0x3ce   : > { %s1234_s16 = scalar_lea.sflag [#allocation4], %s1302_s15  ;;  %s970_s17 = scalar_lea.vmem %s1230_s14, 256 }
 0x3cf   : > { %p971_p1 = scmp.ne.s32.totalorder %s1230_s14, %s970_s17  ;;  %s1069_s22 = smov [#allocation3]  }
 0x3d0   : > { %s974_s26 = sshll.u32 %s1069_s22, 4  ;;  %s975_s26 = int_to_ptr.vmem [resolvable:$false] %s974_s26 }
 0x3d1   : > { %p972_p2 = pnand %p971_p1, %p1151_p3  ;;  %s976_s11 = scalar_lea.vmem %s975_s26, 512 }
 0x3d2   : > { %p977_p5 = scmp.lt.s32.totalorder %s1230_s14, %s975_s26  ;;  %p978_p6 = scmp.lt.s32.totalorder %s976_s11, %s970_s17 }
 0x3d3   : > { %p973_p4 = pneg %p972_p2 }
 0x3d4   : > { %p979_p7 = por %p978_p6, %p977_p5 }
 0x3d6   : > { %p980_p8 = pnand %p979_p7, %p973_p4 }
 0x3d8   : > { %983 = shalt.err (!%p980_p8)
}
 0x3d9   : > { %s984_s10 = scalar_lea.hbm %s1227_s13, 256  ;;  %s988_s7 = scalar_lea.hbm %s1291_s5, 512 }
 0x3da   : > { %p985_p10 = scmp.ne.s32.totalorder %s1227_s13, %s984_s10  ;;  %p989_p13 = scmp.lt.u32.totalorder %s1227_s13, %s1291_s5 }
 0x3db   : > { %p990_p0 = scmp.lt.u32.totalorder %s988_s7, %s984_s10  ;;  %p992_p2 = scmp.lt.u32.totalorder %s984_s10, %s1227_s13 }
 0x3dc   : > { %p986_p11 = pnand %p985_p10, %p1151_p3 }
 0x3dd   : > { %p991_p1 = por %p990_p0, %p989_p13 }
 0x3de   : > { %p987_p12 = pneg %p986_p11 }
 0x3df   : > { %p993_p4 = por %p992_p2, %p991_p1 }
 0x3e1   : > { %p994_p5 = pnand %p993_p4, %p987_p12 }
 0x3e3   : > { %997 = shalt.err (!%p994_p5)
}
 0x3e4   : > { %s1070_s12 = smov 128   ;;  %s1071_s23 = smov 8  }
 0x3e5   : > { %886 = dma.vmem_to_hbm [thread:$0]  (%p1151_p3), %s1230_s14, 256, %s1227_s13, %s1234_s16, %s1070_s12, %s1070_s12, %s1071_s23  }
 0x3e6 PF: > { %p892_p6 = scmp.ge.s32.totalorder %s1064_s25, 2  ;;  %s703_s24 = sand.u32 1, %s1036_s18  }
 0x3e7   : > { %s704_s28 = scalar_lea.sflag [#allocation4], %s703_s24 }
 0x3e8   : > { %p889_p7 = pnand %p892_p6, %p1161_p9 }
 0x3ea   : > { %1031 = dma.done.wait (!%p889_p7), %s704_s28, 256  }
 0x3eb   : > { %1033 = vsyncadd (!%p889_p7), %s704_s28, 4294967040  ;;  %s18_s25 = sadd.s32 1, %s1064_s25   ;;  %s1303_s21 = sld [smem:[#allocation6_spill]] }
 0x3ec   : > { %p15_p8 = scmp.ge.s32.totalorder %s18_s25, 10   ;;  %s1304_s22 = sld [smem:[#allocation7_spill]] }
 0x3ed   : > { %s1305_s23 = sld [smem:[#allocation8_spill]]  ;;  %s1306_s24 = sld [smem:[#allocation9_spill]] }
 0x3ee   : > { %s1307_s18 = smov %s1040_s19  ;;  %s1308_s19 = smov %s1044_s20 }
 0x3ef   : > { %s1309_s20 = smov %s1169_s9  ;;  %17 = sbr.rel (!%p15_p8) target bundleno = 5 (0x5), region = 89 }
 0x3f6   :  { %709 = vsyncpa [#allocation4], 1 }
 0x3f7   :  { %711 = vsyncpa [#allocation4 + $0x1], 1 }

</bundles_post_ra>
